<compile_context>
chip_gen: v6e
topology: v6e:2x2x1
jax: 0.10.0
libtpu: 0.0.40
codegen_flags: <defaults>
</compile_context>

<pallas_src>
import functools

import jax
import jax.numpy as jnp
from jax import lax
from jax.experimental import pallas as pl
from jax.experimental.pallas import tpu as pltpu


def _cdiv(a, b):
    return (a + b - 1) // b


def _round_up(x, m):
    return ((x + m - 1) // m) * m


def _vmem_limit_bytes():
    """Generation-aware VMEM limit: ~75% of physical capacity."""
    cap = 64 * 1024 * 1024  # conservative fallback (v7x physical per-TC VMEM)
    try:
        info = pltpu.get_tpu_info()
        cap = int(getattr(info, "vmem_capacity_bytes", cap))
    except Exception:
        pass
    cap = min(max(cap, 32 * 1024 * 1024), 128 * 1024 * 1024)
    return max((cap * 3) // 4, 32 * 1024 * 1024)


# ----------------------------- kernel helpers ------------------------------


def _scores_vpu(ctx, out_f32):
    # scores[b, s] = sum_d ctx[b, s, d] * out[b, d]
    # VPU multiply + XLU lane reduce (f32 accumulation).  Avoids Bt tiny
    # one-column MXU matmuls that waste the 256-wide MXU on v6e/v7x.
    return jnp.sum(ctx * out_f32[:, None, :], axis=-1)


def _mix_vpu(p, ctx):
    # mix[b, d] = sum_s p[b, s] * ctx[b, s, d]  (VPU multiply + sublane reduce)
    return jnp.sum(p[:, :, None] * ctx, axis=1)


def _linear_tanh(mix_f32, output_ref, w_mix_ref, w_out_ref, b_ref):
    # tanh([mix ; output] @ W^T + b) == tanh(mix@w_mix + output@w_out + b).
    # Real (D, D) matmuls -> MXU, in the weight (activation) dtype, f32 acc.
    combined = (
        jnp.dot(mix_f32.astype(w_mix_ref.dtype), w_mix_ref[...],
                preferred_element_type=jnp.float32)
        + jnp.dot(output_ref[...].astype(w_out_ref.dtype), w_out_ref[...],
                  preferred_element_type=jnp.float32)
        + b_ref[...].astype(jnp.float32))
    return jnp.tanh(combined)


# ------------------------------- kernels ------------------------------------


def _single_block_kernel(output_ref, context_ref, w_mix_ref, w_out_ref, b_ref,
                         attended_ref, attn_ref):
    """Whole sequence fits in one VMEM tile: plain (max-subtracted) softmax."""
    out_f32 = output_ref[...].astype(jnp.float32)          # (Bt, D)
    ctx = context_ref[...]                                  # (Bt, S, D)

    scores = _scores_vpu(ctx, out_f32)                      # (Bt, S) f32
    m = jnp.max(scores, axis=-1, keepdims=True)
    p = jnp.exp(scores - m)
    inv_l = pl.reciprocal(jnp.sum(p, axis=-1, keepdims=True), approx=False)
    attn = p * inv_l
    attn_ref[...] = attn.astype(attn_ref.dtype)

    mix = _mix_vpu(attn, ctx)                               # (Bt, D) f32
    attended_ref[...] = _linear_tanh(
        mix, output_ref, w_mix_ref, w_out_ref, b_ref).astype(attended_ref.dtype)


def _flash_kernel(output_ref, context_ref, w_mix_ref, w_out_ref, b_ref,
                  attended_ref, p_ref, mtile_ref, lfin_ref,
                  m_ref, l_ref, mix_ref, *, seq_len, num_s_tiles):
    """Flash-style online softmax over an S grid axis ('arbitrary', innermost).

    Per S tile it emits the unnormalized probabilities and the running max;
    the exact attention-weight normalization is a tiny elementwise fix-up in
    the wrapper.  The attended output is fully computed in-kernel.
    """
    j = pl.program_id(1)
    s_tile = context_ref.shape[1]

    @pl.when(j == 0)
    def _init():
        m_ref[...] = jnp.full_like(m_ref, -jnp.inf)
        l_ref[...] = jnp.zeros_like(l_ref)
        mix_ref[...] = jnp.zeros_like(mix_ref)

    out_f32 = output_ref[...].astype(jnp.float32)           # (Bt, D)
    ctx = context_ref[...]                                   # (Bt, St, D)

    if seq_len % s_tile != 0:
        # Ragged tail: zero out-of-range context (may be garbage / NaN) and
        # send its scores to -inf so it contributes nothing to softmax / mix.
        col = j * s_tile + lax.broadcasted_iota(jnp.int32, (1, s_tile), 1)
        valid = col < seq_len                                # (1, St)
        ctx = jnp.where(valid[:, :, None], ctx, 0.0)
        scores = jnp.where(valid, _scores_vpu(ctx, out_f32), -jnp.inf)
    else:
        scores = _scores_vpu(ctx, out_f32)                   # (Bt, St) f32

    m_old = m_ref[...]
    m_new = jnp.maximum(m_old, jnp.max(scores, axis=-1, keepdims=True))
    alpha = jnp.exp(m_old - m_new)
    p = jnp.exp(scores - m_new)                              # (Bt, St) f32

    l_ref[...] = alpha * l_ref[...] + jnp.sum(p, axis=-1, keepdims=True)
    mix_ref[...] = alpha * mix_ref[...] + _mix_vpu(p, ctx)
    m_ref[...] = m_new

    p_ref[...] = p                                           # unnormalized probs
    mtile_ref[...] = m_new[None]                             # (1, Bt, 1) run. max

    @pl.when(j == num_s_tiles - 1)
    def _finalize():
        lfin_ref[...] = l_ref[...]
        mix = mix_ref[...] * pl.reciprocal(l_ref[...], approx=False)
        attended_ref[...] = _linear_tanh(
            mix, output_ref, w_mix_ref, w_out_ref,
            b_ref).astype(attended_ref.dtype)


# ------------------------------ host wrapper ---------------------------------


def prepare_attention_params(weight, bias, param_dtype=None):
    """One-time preprocessing of the Linear(2D -> D) parameters.

    Transposes and splits the torch-layout weight (D, 2D) into w_mix / w_out so
    the kernel computes mix @ w_mix + output @ w_out + b (== concat + Linear)
    without an in-kernel lane-axis concat, and casts the weights to the
    activation dtype (bf16-ready) so the output projection runs on the fast
    MXU path and resident weight VMEM is halved for bf16 models.
    """
    D = bias.shape[0]
    if param_dtype is None:
        param_dtype = weight.dtype
    w_t = jnp.transpose(weight).astype(param_dtype)          # (2D, D)
    w_mix = w_t[:D, :]                                       # acts on `mix`
    w_out = w_t[D:, :]                                       # acts on `output`
    b = bias.astype(jnp.float32).reshape(1, D)
    return w_mix, w_out, b


def _plan_tiles(B, S, D, ctx_itemsize, out_itemsize, w_itemsize, vmem_limit):
    """Pick (b_tile, s_tile) so the pipelined working set fits the VMEM budget."""
    # Sublane quantum for partial batch tiles: 8 rows f32, 16 bf16, 32 int8/fp8.
    quantum = max(8, 32 // max(1, min(ctx_itemsize, out_itemsize)))

    # Resident parameters (w_mix, w_out, bias; assume double-buffered).
    resident = 2 * (2 * D * D + D) * w_itemsize
    budget = max(int(vmem_limit * 0.85) - resident, 64 * 1024)

    # Per-batch-row VMEM bytes, split into S-tile-proportional and fixed parts
    # (context double-buffer, f32 elementwise-product temporaries, outputs,
    #  accumulator scratch).
    per_st = 2 * D * ctx_itemsize + 2 * D * 4 + 6 * 4
    fixed = (2 * D * ctx_itemsize + 2 * D * out_itemsize
             + 3 * S * 4 + (D + 2 * 128) * 4)

    min_rows = min(B, quantum)
    avail = budget // min_rows

    # Prefer the whole sequence per grid step; otherwise lane-aligned S tiles.
    if S <= 128 or avail >= fixed + per_st * S:
        s_tile = S
    else:
        s_tile = max(128, (max(0, avail - fixed) // per_st) // 128 * 128)
        if s_tile >= S:
            s_tile = S
    # TODO(synk): if even (quantum, 128, D) exceeds the budget (huge D), a
    #             D-axis tile with partial-dot accumulation would be required.

    row_bytes = fixed + per_st * s_tile
    if B <= quantum:
        b_tile = B
    else:
        b_tile = min(B, budget // row_bytes)
        b_tile = max(quantum, (b_tile // quantum) * quantum)
        # Keep >=2 (ideally ~4) batch grid steps so both v7x TensorCores get
        # work under dimension_semantics=("parallel", ...).  Near-free on
        # single-TC v5e/v6e (an extra ~0.35us pipeline step).
        target_steps = 4 if B >= 4 * quantum else 2
        b_tile = min(b_tile, _round_up(_cdiv(B, target_steps), quantum))
    return b_tile, s_tile


def attention_forward(output, context, w_mix, w_out, b, *, plan=None):
    """output: (B, D), context: (B, S, D), w_mix/w_out: (D, D), b: (1, D)."""
    B, S, D = context.shape
    assert output.shape == (B, D)
    assert w_mix.shape == (D, D) and w_out.shape == (D, D)
    assert b.shape == (1, D)

    vmem_limit = _vmem_limit_bytes()
    if plan is None:
        b_tile, s_tile = _plan_tiles(
            B, S, D,
            jnp.dtype(context.dtype).itemsize,
            jnp.dtype(output.dtype).itemsize,
            jnp.dtype(w_mix.dtype).itemsize,
            vmem_limit)
    else:
        b_tile, s_tile = plan

    grid_b = _cdiv(B, b_tile)
    n_s = _cdiv(S, s_tile)
    grid = (grid_b, n_s)

    param_specs = [
        pl.BlockSpec((D, D), lambda i, j: (0, 0)),           # w_mix (resident)
        pl.BlockSpec((D, D), lambda i, j: (0, 0)),           # w_out (resident)
        pl.BlockSpec((1, D), lambda i, j: (0, 0)),           # bias  (resident)
    ]
    compiler_params = pltpu.CompilerParams(
        dimension_semantics=("parallel", "arbitrary"),
        vmem_limit_bytes=vmem_limit)

    if n_s == 1:
        # Fast path: whole sequence fits in one tile per batch block.
        attended, attn = pl.pallas_call(
            _single_block_kernel,
            out_shape=(jax.ShapeDtypeStruct((B, D), output.dtype),
                       jax.ShapeDtypeStruct((B, S), output.dtype)),
            grid=grid,
            in_specs=[pl.BlockSpec((b_tile, D), lambda i, j: (i, 0)),
                      pl.BlockSpec((b_tile, S, D), lambda i, j: (i, 0, 0)),
                      *param_specs],
            out_specs=(pl.BlockSpec((b_tile, D), lambda i, j: (i, 0)),
                       pl.BlockSpec((b_tile, S), lambda i, j: (i, 0))),
            compiler_params=compiler_params,
        )(output, context, w_mix, w_out, b)
        return attended, attn

    # Flash-style S tiling (online softmax) for long sequences.
    kernel = functools.partial(_flash_kernel, seq_len=S, num_s_tiles=n_s)
    attended, p_unnorm, m_tiles, l_final = pl.pallas_call(
        kernel,
        out_shape=(
            jax.ShapeDtypeStruct((B, D), output.dtype),       # attended
            jax.ShapeDtypeStruct((B, S), jnp.float32),        # unnormalized probs
            jax.ShapeDtypeStruct((n_s, B, 1), jnp.float32),   # per-tile run. max
            jax.ShapeDtypeStruct((B, 1), jnp.float32),        # softmax denom
        ),
        grid=grid,
        in_specs=[pl.BlockSpec((b_tile, D), lambda i, j: (i, 0)),
                  pl.BlockSpec((b_tile, s_tile, D), lambda i, j: (i, j, 0)),
                  *param_specs],
        out_specs=(
            pl.BlockSpec((b_tile, D), lambda i, j: (i, 0)),
            pl.BlockSpec((b_tile, s_tile), lambda i, j: (i, j)),
            pl.BlockSpec((1, b_tile, 1), lambda i, j: (j, i, 0)),
            pl.BlockSpec((b_tile, 1), lambda i, j: (i, 0)),
        ),
        scratch_shapes=[
            pltpu.VMEM((b_tile, 1), jnp.float32),             # running max
            pltpu.VMEM((b_tile, 1), jnp.float32),             # running denom
            pltpu.VMEM((b_tile, D), jnp.float32),             # mix accumulator
        ],
        compiler_params=compiler_params,
    )(output, context, w_mix, w_out, b)

    # Exact normalization fix-up for the attention weights (tiny elementwise
    # XLA pass over (B, S); the attended output is already normalized in-kernel):
    #   attn[:, s in tile j] = p_unnorm * exp(m_tile_j - m_final) / l_final
    m_final = m_tiles[n_s - 1, :, 0]                                   # (B,)
    scale = jnp.exp(jnp.transpose(m_tiles[:, :, 0]) - m_final[:, None])  # (B, n_s)
    scale_cols = jnp.repeat(scale, s_tile, axis=1)[:, :S]              # (B, S)
    attn = (p_unnorm * scale_cols / l_final).astype(output.dtype)
    return attended, attn


# ------------------------------- reference -----------------------------------


def attention_reference(output, context, weight, bias):
    scores = jnp.einsum("bsd,bd->bs", context, output)
    attn = jax.nn.softmax(scores, axis=-1)
    mix = jnp.einsum("bs,bsd->bd", attn, context)
    combined = jnp.concatenate([mix, output], axis=1)
    out = jnp.tanh(combined @ weight.T + bias)
    return out, attn


def _make_inputs(key, B, S, D, dtype=jnp.float32):
    k_out, k_ctx, k_w, k_b = jax.random.split(key, 4)
    output = jax.random.normal(k_out, (B, D), dtype=dtype)
    context = jax.random.normal(k_ctx, (B, S, D), dtype=dtype)
    # Deterministic Linear(2D -> D) init (PyTorch-style uniform fan-in bound).
    bound = 1.0 / float(2.0 * D) ** 0.5
    weight = jax.random.uniform(k_w, (D, 2 * D), minval=-bound, maxval=bound,
                                dtype=jnp.float32)
    bias = jax.random.uniform(k_b, (D,), minval=-bound, maxval=bound,
                              dtype=jnp.float32)
    return output, context, weight, bias


def _run_check(key, B, S, D, plan=None, atol=1e-5, rtol=1e-5):
    output, context, weight, bias = _make_inputs(key, B, S, D)
    w_mix, w_out, b = prepare_attention_params(weight, bias,
                                               param_dtype=output.dtype)
    out, attn = attention_forward(output, context, w_mix, w_out, b, plan=plan)
    out, attn = jax.block_until_ready((out, attn))
    ref_out, ref_attn = attention_reference(output, context, weight, bias)
    assert jnp.allclose(out, ref_out, atol=atol, rtol=rtol), ("out", B, S, D, plan)
    assert jnp.allclose(attn, ref_attn, atol=atol, rtol=rtol), ("attn", B, S, D, plan)


if __name__ == "__main__":
    k1, k2, k3 = jax.random.split(jax.random.PRNGKey(0), 3)
    # Docstring-scale shapes: single-tile fast path (auto-planned tiles).
    _run_check(k1, B=2, S=8, D=32)
    # Flash-style S-tiled path (forced small tiles), S divisible by the tile.
    _run_check(k2, B=2, S=256, D=128, plan=(2, 128), atol=2e-5, rtol=2e-5)
    # Ragged batch tile (B=10, b_tile=8) and ragged S tile (S=320, s_tile=128).
    _run_check(k3, B=10, S=320, D=128, plan=(8, 128), atol=2e-5, rtol=2e-5)
    print("KERNEL_OK")
</pallas_src>

<mosaic_0001>
module attributes {stable_mosaic.version = 11 : i64} {
  func.func @_single_block_kernel(%arg0: i32, %arg1: i32, %arg2: memref<2x32xf32, #tpu.memory_space<vmem>>, %arg3: memref<2x8x32xf32, #tpu.memory_space<vmem>>, %arg4: memref<32x32xf32, #tpu.memory_space<vmem>>, %arg5: memref<32x32xf32, #tpu.memory_space<vmem>>, %arg6: memref<1x32xf32, #tpu.memory_space<vmem>>, %arg7: memref<2x32xf32, #tpu.memory_space<vmem>>, %arg8: memref<2x8xf32, #tpu.memory_space<vmem>>) attributes {dimension_semantics = [#tpu.dimension_semantics<parallel>, #tpu.dimension_semantics<arbitrary>], iteration_bounds = array<i64: 1, 1>, scalar_prefetch = 0 : i64, scratch_operands = 0 : i64, tpu.core_type = #tpu.core_type<tc>, window_params = [{transform_indices = @transform_0, window_bounds = array<i64: 2, 32>}, {transform_indices = @transform_1, window_bounds = array<i64: 2, 8, 32>}, {pipeline_mode = #tpu.pipeline_mode<synchronous>, transform_indices = @transform_2, window_bounds = array<i64: 32, 32>}, {pipeline_mode = #tpu.pipeline_mode<synchronous>, transform_indices = @transform_3, window_bounds = array<i64: 32, 32>}, {pipeline_mode = #tpu.pipeline_mode<synchronous>, transform_indices = @transform_4, window_bounds = array<i64: 1, 32>}, {transform_indices = @transform_5, window_bounds = array<i64: 2, 32>}, {transform_indices = @transform_6, window_bounds = array<i64: 2, 8>}]} {
    %c0 = arith.constant 0 : index
    %c0_0 = arith.constant 0 : index
    %0 = vector.load %arg2[%c0, %c0_0] : memref<2x32xf32, #tpu.memory_space<vmem>>, vector<2x32xf32>
    %c0_1 = arith.constant 0 : index
    %c0_2 = arith.constant 0 : index
    %c0_3 = arith.constant 0 : index
    %1 = vector.load %arg3[%c0_1, %c0_2, %c0_3] : memref<2x8x32xf32, #tpu.memory_space<vmem>>, vector<2x8x32xf32>
    %2 = vector.shape_cast %0 : vector<2x32xf32> to vector<2x1x32xf32>
    %3 = vector.broadcast %2 : vector<2x1x32xf32> to vector<2x8x32xf32>
    %4 = arith.mulf %1, %3 : vector<2x8x32xf32>
    %cst = arith.constant dense<0.000000e+00> : vector<2x8xf32>
    %5 = vector.multi_reduction <add>, %4, %cst [2] : vector<2x8x32xf32> to vector<2x8xf32>
    %cst_4 = arith.constant dense<0xFF800000> : vector<2xf32>
    %6 = vector.multi_reduction <maximumf>, %5, %cst_4 [1] : vector<2x8xf32> to vector<2xf32>
    %7 = vector.shape_cast %6 : vector<2xf32> to vector<2x1xf32>
    %8 = vector.broadcast %7 : vector<2x1xf32> to vector<2x8xf32>
    %9 = arith.subf %5, %8 : vector<2x8xf32>
    %10 = math.exp %9 : vector<2x8xf32>
    %cst_5 = arith.constant dense<0.000000e+00> : vector<2xf32>
    %11 = vector.multi_reduction <add>, %10, %cst_5 [1] : vector<2x8xf32> to vector<2xf32>
    %12 = vector.shape_cast %11 : vector<2xf32> to vector<2x1xf32>
    %13 = tpu.reciprocal %12 : vector<2x1xf32> -> vector<2x1xf32>
    %14 = vector.broadcast %13 : vector<2x1xf32> to vector<2x8xf32>
    %15 = arith.mulf %10, %14 : vector<2x8xf32>
    %c0_6 = arith.constant 0 : index
    %c0_7 = arith.constant 0 : index
    %16 = vector.load %arg8[%c0_6, %c0_7] : memref<2x8xf32, #tpu.memory_space<vmem>>, vector<2x8xf32>
    tpu.vector_store %arg8[%c0_6, %c0_7], %15 {strides = array<i32>} : memref<2x8xf32, #tpu.memory_space<vmem>>, vector<2x8xf32>,
    %17 = vector.shape_cast %15 : vector<2x8xf32> to vector<2x8x1xf32>
    %18 = vector.broadcast %17 : vector<2x8x1xf32> to vector<2x8x32xf32>
    %19 = arith.mulf %18, %1 : vector<2x8x32xf32>
    %cst_8 = arith.constant dense<0.000000e+00> : vector<2x32xf32>
    %20 = vector.multi_reduction <add>, %19, %cst_8 [1] : vector<2x8x32xf32> to vector<2x32xf32>
    %c0_9 = arith.constant 0 : index
    %c0_10 = arith.constant 0 : index
    %21 = vector.load %arg4[%c0_9, %c0_10] : memref<32x32xf32, #tpu.memory_space<vmem>>, vector<32x32xf32>
    %cst_11 = arith.constant dense<0.000000e+00> : vector<2x32xf32>
    %22 = tpu.matmul %20, %21, %cst_11 {dimension_numbers = #tpu.dot_dimension_numbers<[1], [0], [0], [1], [0, 0, 1, 1], [], []>} : vector<2x32xf32>, vector<32x32xf32>, vector<2x32xf32> -> vector<2x32xf32>
    %c0_12 = arith.constant 0 : index
    %c0_13 = arith.constant 0 : index
    %23 = vector.load %arg2[%c0_12, %c0_13] : memref<2x32xf32, #tpu.memory_space<vmem>>, vector<2x32xf32>
    %c0_14 = arith.constant 0 : index
    %c0_15 = arith.constant 0 : index
    %24 = vector.load %arg5[%c0_14, %c0_15] : memref<32x32xf32, #tpu.memory_space<vmem>>, vector<32x32xf32>
    %cst_16 = arith.constant dense<0.000000e+00> : vector<2x32xf32>
    %25 = tpu.matmul %23, %24, %cst_16 {dimension_numbers = #tpu.dot_dimension_numbers<[1], [0], [0], [1], [0, 0, 1, 1], [], []>} : vector<2x32xf32>, vector<32x32xf32>, vector<2x32xf32> -> vector<2x32xf32>
    %26 = arith.addf %22, %25 : vector<2x32xf32>
    %c0_17 = arith.constant 0 : index
    %c0_18 = arith.constant 0 : index
    %27 = vector.load %arg6[%c0_17, %c0_18] : memref<1x32xf32, #tpu.memory_space<vmem>>, vector<1x32xf32>
    %28 = vector.broadcast %27 : vector<1x32xf32> to vector<2x32xf32>
    %29 = arith.addf %26, %28 : vector<2x32xf32>
    %30 = math.tanh %29 : vector<2x32xf32>
    %c0_19 = arith.constant 0 : index
    %c0_20 = arith.constant 0 : index
    %31 = vector.load %arg7[%c0_19, %c0_20] : memref<2x32xf32, #tpu.memory_space<vmem>>, vector<2x32xf32>
    tpu.vector_store %arg7[%c0_19, %c0_20], %30 {strides = array<i32>} : memref<2x32xf32, #tpu.memory_space<vmem>>, vector<2x32xf32>,
    return
  }
  func.func @transform_0(%arg0: i32, %arg1: i32) -> (i32, i32) {
    %c0_i32 = arith.constant 0 : i32
    %c0_i32_0 = arith.constant 0 : i32
    return %arg0, %c0_i32 : i32, i32
  }
  func.func @transform_1(%arg0: i32, %arg1: i32) -> (i32, i32, i32) {
    %c0_i32 = arith.constant 0 : i32
    %c0_i32_0 = arith.constant 0 : i32
    %c0_i32_1 = arith.constant 0 : i32
    return %arg0, %c0_i32, %c0_i32_0 : i32, i32, i32
  }
  func.func @transform_2(%arg0: i32, %arg1: i32) -> (i32, i32) {
    %c0_i32 = arith.constant 0 : i32
    %c0_i32_0 = arith.constant 0 : i32
    %c0_i32_1 = arith.constant 0 : i32
    return %c0_i32, %c0_i32_0 : i32, i32
  }
  func.func @transform_3(%arg0: i32, %arg1: i32) -> (i32, i32) {
    %c0_i32 = arith.constant 0 : i32
    %c0_i32_0 = arith.constant 0 : i32
    %c0_i32_1 = arith.constant 0 : i32
    return %c0_i32, %c0_i32_0 : i32, i32
  }
  func.func @transform_4(%arg0: i32, %arg1: i32) -> (i32, i32) {
    %c0_i32 = arith.constant 0 : i32
    %c0_i32_0 = arith.constant 0 : i32
    %c0_i32_1 = arith.constant 0 : i32
    return %c0_i32, %c0_i32_0 : i32, i32
  }
  func.func @transform_5(%arg0: i32, %arg1: i32) -> (i32, i32) {
    %c0_i32 = arith.constant 0 : i32
    %c0_i32_0 = arith.constant 0 : i32
    return %arg0, %c0_i32 : i32, i32
  }
  func.func @transform_6(%arg0: i32, %arg1: i32) -> (i32, i32) {
    %c0_i32 = arith.constant 0 : i32
    %c0_i32_0 = arith.constant 0 : i32
    return %arg0, %c0_i32 : i32, i32
  }
}

</mosaic_0001>

<bundles_post_ra>
// kernel: tpu_custom_call.1
= control target key start
LH: loop header
LB: loop body
LE: loop exit
PB: predicated region body
PF: predicated region fallthrough
CT: control target
= control target key end

     0   :  { %12 = vsyncpa [#allocation3], 0  ;;  %s723_s0 = inlined_call_operand.hbm [shape: f32[2,32], index: 0, kind: input, shape index: {}]   ;;  %s724_s1 = inlined_call_operand.hbm [shape: f32[2,8,32], index: 1, kind: input, shape index: {}]   ;;  %s725_s2 = inlined_call_operand.hbm [shape: f32[32,32], index: 2, kind: input, shape index: {}]   ;;  %s726_s3 = inlined_call_operand.hbm [shape: f32[32,32], index: 3, kind: input, shape index: {}]   ;;  %s727_s4 = inlined_call_operand.vmem [shape: f32[1,32], index: 4, kind: input, shape index: {}]   ;;  %s728_s5 = inlined_call_operand.hbm [shape: f32[2,32], index: 5, kind: output, shape index: {0}]   ;;  %s729_s6 = inlined_call_operand.hbm [shape: f32[2,8], index: 6, kind: output, shape index: {1}]  }
   0x1   :  { %13 = vsyncpa [#allocation6], 0 }
   0x2   :  { %14 = vsyncpa [#allocation9], 0 }
   0x3   :  { %15 = vsyncpa [#allocation4], 0 }
   0x4   :  { %16 = vsyncpa [#allocation12], 0  ;;  %s617_s21 = smov [#allocation5]  }
   0x5   :  { %s32_s22 = sshll.u32 %s617_s21, 4  ;;  %s33_s22 = int_to_ptr.vmem [resolvable:$true] %s32_s22 }
   0x6   :  { %s495_s23 = scalar_lea.vmem %s33_s22, 256  ;;  %p500_p1 = scmp.lt.s32.totalorder %s33_s22, %s33_s22 }
   0x7   :  { %p496_p0 = scmp.ne.s32.totalorder %s33_s22, %s495_s23  ;;  %p501_p2 = scmp.lt.s32.totalorder %s495_s23, %s495_s23 }
   0x9   :  { %p502_p3 = por %p501_p2, %p500_p1 }
   0xb   :  { %p503_p4 = pnand %p502_p3, %p496_p0 }
   0xd   :  { %506 = shalt.err (!%p503_p4)
}
   0xe   :  { %s618_s24 = smov 128   ;;  %s619_s25 = smov 8  }
   0xf   :  { %38 = dma.hbm_to_vmem [thread:$0]  %s724_s1, 256, %s33_s22, [#allocation6], %s618_s24, %s618_s24, %s619_s25  }
  0x10   :  { %s620_s28 = smov [#allocation2]   ;;  %s621_s30 = smov [#allocation7]  }
  0x11   :  { %s23_s29 = sshll.u32 %s620_s28, 4  ;;  %s44_s7 = sshll.u32 %s621_s30, 4  ;;  %s24_s29 = int_to_ptr.vmem [resolvable:$true] %s23_s29  ;;  %s45_s7 = int_to_ptr.vmem [resolvable:$true] %s44_s7 }
  0x12   :  { %s515_s8 = scalar_lea.vmem %s24_s29, 32  ;;  %p520_p6 = scmp.lt.s32.totalorder %s24_s29, %s24_s29 }
  0x13   :  { %p516_p5 = scmp.ne.s32.totalorder %s24_s29, %s515_s8  ;;  %p521_p7 = scmp.lt.s32.totalorder %s515_s8, %s515_s8 }
  0x15   :  { %p522_p8 = por %p521_p7, %p520_p6 }
  0x17   :  { %p523_p9 = pnand %p522_p8, %p516_p5 }
  0x19   :  { %526 = shalt.err (!%p523_p9)
}
  0x1a   :  { %26 = dma.hbm_to_vmem [thread:$0]  %s723_s0, 32, %s24_s29, [#allocation3]  }
  0x1b   :  { %s535_s11 = scalar_lea.vmem %s45_s7, 512  ;;  %p540_p11 = scmp.lt.s32.totalorder %s45_s7, %s45_s7 }
  0x1c   :  { %p536_p10 = scmp.ne.s32.totalorder %s45_s7, %s535_s11  ;;  %p541_p12 = scmp.lt.s32.totalorder %s535_s11, %s535_s11 }
  0x1e   :  { %p542_p13 = por %p541_p12, %p540_p11 }
  0x20   :  { %p543_p0 = pnand %p542_p13, %p536_p10 }
  0x22   :  { %546 = shalt.err (!%p543_p0)
}
  0x23   :  { %50 = dma.hbm_to_vmem [thread:$0]  %s725_s2, 512, %s45_s7, [#allocation6], %s618_s24, %s618_s24, %s619_s25  }
  0x24   :  { %s622_s13 = smov [#allocation8]  }
  0x25   :  { %s56_s14 = sshll.u32 %s622_s13, 4  ;;  %s57_s14 = int_to_ptr.vmem [resolvable:$true] %s56_s14 }
  0x26   :  { %s555_s15 = scalar_lea.vmem %s57_s14, 512  ;;  %p560_p2 = scmp.lt.s32.totalorder %s57_s14, %s57_s14 }
  0x27   :  { %p556_p1 = scmp.ne.s32.totalorder %s57_s14, %s555_s15  ;;  %p561_p3 = scmp.lt.s32.totalorder %s555_s15, %s555_s15 }
  0x29   :  { %p562_p4 = por %p561_p3, %p560_p2 }
  0x2b   :  { %p563_p5 = pnand %p562_p4, %p556_p1 }
  0x2d   :  { %566 = shalt.err (!%p563_p5)
}
  0x2e   :  { %62 = dma.hbm_to_vmem [thread:$0]  %s726_s3, 512, %s57_s14, [#allocation9], %s618_s24, %s618_s24, %s619_s25  }
  0x2f   :  { %607 = dma.done.wait [#allocation3], 32  }
  0x30   :  { %608 = vsyncadd [#allocation3], 4294967264 }
  0x31   :  { %609 = dma.done.wait [#allocation6], 768  }
  0x32   :  { %610 = vsyncadd [#allocation6], 4294966528 }
  0x33   :  { %611 = dma.done.wait [#allocation9], 512  }
  0x34   :  { %612 = vsyncadd [#allocation9], 4294966784  ;;  %v92_v0 = vlaneseq  ;;  %v623_v1 = vmov 1966171168   ;;  %v687_v12 = vld [vmem:[#allocation5] sm:$0xff]  ;;  %vm115_vm0 = vcmask 261120  }
  0x35   :  { %v90_v2 = vunpack.c.l.s4 %v623_v1  ;;  %v429_v9 = vld.sshfl [vmem:[#allocation2] sm:$0x11 pattern:$0x75316420]  ;;  %v689_v15 = vld [vmem:[#allocation5 + $0x8] sm:$0xff]  ;;  %vm134_vm1 = vcmask 1041409  }
  0x36   :  { %v93_v3 = vshrl.u32 %v92_v0, 7  ;;  %v125_v4 = vand.u32 127, %v92_v0  ;;  %v88_v11 = vcombine.high %v429_v9, %v429_v9  ;;  %vm137_vm2 = vcmask 58368   ;;  %v238_v51 = vld [vmem:[#allocation8 + $0x18] sm:$0xff]  ;;  %v237_v52 = vld [vmem:[#allocation8 + $0x10] sm:$0xff]  ;;  %v236_v54 = vld [vmem:[#allocation8 + $0x8] sm:$0xff] }
  0x37   :  { %v91_v5 = vunpack.c.0.s8 %v90_v2  ;;  %v624_v27 = vmov 0   ;;  %v625_v50 = vmov 0.0   ;;  %v233_v53 = vld [vmem:[#allocation7 + $0x18] sm:$0xff]  ;;  %v232_v55 = vld [vmem:[#allocation7 + $0x10] sm:$0xff]  ;;  %v235_v56 = vld [vmem:[#allocation8] sm:$0xff]  ;;  %vm626_vm3 = vmmov 0  }
  0x38   :  { %v685_v6 = vsub.s32 %v125_v4, %v93_v3  ;;  %v105_v8 = vsub.s32 0, %v93_v3  ;;  %478 = vset.pattern.permute.xlu0 %v624_v27  ;;  %477 = vset.pattern.permute.xlu1 %v624_v27  ;;  %v148_v28 = vsub.s32 1, %v93_v3  ;;  %v231_v57 = vld [vmem:[#allocation7 + $0x8] sm:$0xff]  ;;  %v230_v59 = vld [vmem:[#allocation7] sm:$0xff]  ;;  %s627_s2 = smov [#allocation11]  }
  0x39   :  { %v94_v7 = vsub.s32 %v91_v5, %v93_v3  ;;  %443 = vmatprep.subr.mxu0 %v625_v50  ;;  %454 = vmatprep.subr.mxu1 %v625_v50  ;;  %v234_v58 = vld [vmem:[#allocation2] sm:$0x3]  ;;  %s414_s3 = sshll.u32 %s627_s2, 4  ;;  %s415_s3 = int_to_ptr.vmem [resolvable:$true] %s414_s3 }
  0x3a   :  { %444 = vmatpush3.msra.mxu0 %v238_v51  ;;  %455 = vmatpush3.msra.mxu1 %v233_v53  ;;  %s567_s17 = scalar_lea.vmem %s415_s3, 32  ;;  %p572_p7 = scmp.lt.s32.totalorder %s415_s3, %s415_s3 }
  0x3b   :  { %v95_v10 = vrot.slane %v429_v9, %v94_v7  ;;  %v102_v14 = vrot.slane %v88_v11, %v94_v7  ;;  %445 = vmatprep.subr.mxu0 %v625_v50  ;;  %456 = vmatprep.subr.mxu1 %v625_v50  ;;  %p568_p6 = scmp.ne.s32.totalorder %s415_s3, %s567_s17  ;;  %p573_p8 = scmp.lt.s32.totalorder %s567_s17, %s567_s17 }
  0x3c   :  { %446 = vmatpush3.msra.mxu0 %v237_v52  ;;  %457 = vmatpush3.msra.mxu1 %v232_v55 }
  0x3d   :  { %v106_v13 = vrot.slane %v95_v10, %v105_v8  ;;  %v110_v17 = vrot.slane %v102_v14, %v105_v8  ;;  %447 = vmatprep.subr.mxu0 %v625_v50  ;;  %458 = vmatprep.subr.mxu1 %v625_v50  ;;  %p574_p9 = por %p573_p8, %p572_p7 }
  0x3e   :  { %448 = vmatpush3.msra.mxu0 %v236_v54  ;;  %451 = vmatprep.mubr.msk.f32.mxu0 %vm626_vm3, %v625_v50 }
  0x3f   :  { %v113_v16 = vmul.f32 %v106_v13, %v687_v12  ;;  %v114_v19 = vmul.f32 %v110_v17, %v689_v15  ;;  %449 = vmatprep.subr.mxu0 %v625_v50  ;;  %459 = vmatpush3.msra.mxu1 %v231_v57  ;;  %p575_p10 = pnand %p574_p9, %p568_p6 }
  0x40   :  { %450 = vmatpush3.msra.mxu0 %v235_v56  ;;  %460 = vmatprep.subr.mxu1 %v625_v50 }
  0x41   :  { %v116_v18 = vsel %vm115_vm0, %v113_v16, 0.0  ;;  %v119_v20 = vsel %vm115_vm0, %v114_v19, 0.0  ;;  %452 = vmatmul.mubr.msk.f32.vlgmr.msra.gmra.mxu0 %vm115_vm0, %v234_v58  ;;  %462 = vmatprep.mubr.msk.f32.mxu1 %vm626_vm3, %v625_v50 }
  0x42   :  { %117 = vadd.xlane.f32.xlu0 %v116_v18  ;;  %461 = vmatpush3.msra.mxu1 %v230_v59 }
  0x46   :  { %120 = vadd.xlane.f32.xlu0 %v119_v20 }
  0xcb   :  { %v118_v21 = vpop.xlane.xlu0 %117 }
  0xcc   :  { %v129_v23 = vrot.slane %v118_v21, %v685_v6 }
  0xcf   :  { %v121_v22 = vpop.xlane.xlu0 %120 }
  0xd0   :  { %v133_v24 = vrot.slane %v121_v22, %v685_v6 }
  0xd2   :  { %v135_v25 = vsel %vm134_vm1, %v133_v24, %v129_v23 }
  0xd3   :  { %v138_v26 = vsel %vm137_vm2, %v135_v25, -inf }
  0xd4   :  { %139 = vmax.xlane.f32.xlu1 %v138_v26 }
 0x15d   :  { %v140_v29 = vpop.xlane.xlu1 %139 }
 0x15e   :  { %v145_v30 = vrot.slane %v140_v29, %v105_v8  ;;  %v149_v31 = vrot.slane %v140_v29, %v148_v28 }
 0x160   :  { %v152_v32 = vsub.f32 %v118_v21, %v145_v30  ;;  %v153_v33 = vsub.f32 %v121_v22, %v149_v31 }
 0x162   :  { %v154_v34 = vmul.f32 1.442695, %v152_v32  ;;  %v156_v35 = vmul.f32 1.442695, %v153_v33 }
 0x164   :  { %479 = vpow2.f32 %v154_v34 }
 0x165   :  { %481 = vpow2.f32 %v156_v35 }
 0x171   :  { %v480_v36 = vpop.eup %479 }
 0x172   :  { %v482_v37 = vpop.eup %481  ;;  %161 = vperm.xlu1 %477, %v480_v36  }
 0x173   :  { %164 = vperm.xlu0 %478, %v482_v37  }
 0x1ed   :  { %v162_v38 = vpop.permute.xlu1 %161 }
 0x1ee   :  { %v165_v39 = vpop.permute.xlu0 %164  ;;  %v169_v40 = vrot.slane %v162_v38, %v685_v6 }
 0x1ef   :  { %v173_v41 = vrot.slane %v165_v39, %v685_v6 }
 0x1f1   :  { %v174_v42 = vsel %vm134_vm1, %v173_v41, %v169_v40 }
 0x1f2   :  { %v176_v43 = vsel %vm137_vm2, %v174_v42, 0.0 }
 0x1f3   :  { %177 = vadd.xlane.f32.xlu1 %v176_v43 }
 0x27c   :  { %v178_v44 = vpop.xlane.xlu1 %177 }
 0x27d   :  { %483 = vrcp.f32 %v178_v44 }
 0x28a   :  { %v484_v45 = vpop.eup %483 }
 0x28b   :  { %v184_v46 = vrot.slane %v484_v45, %v105_v8  ;;  %v188_v48 = vrot.slane %v484_v45, %v148_v28 }
 0x28d   :  { %v191_v47 = vmul.f32 %v480_v36, %v184_v46  ;;  %v192_v49 = vmul.f32 %v482_v37, %v188_v48 }
 0x28f   :  { %196 = vperm.xlu0 %478, %v191_v47  }
 0x293   :  { %199 = vperm.xlu0 %478, %v192_v49  }
 0x30a   :  { %v197_v60 = vpop.permute.xlu0 %196 }
 0x30b   :  { %v214_v61 = vmul.f32 %v197_v60, %v687_v12  ;;  %v204_v1 = vrot.slane %v197_v60, %v685_v6 }
 0x30d   :  { %v216_v62 = vsel %vm115_vm0, %v214_v61, 0.0 }
 0x30e   :  { %v217_v63 = vrot.slane %v216_v62, 4  ;;  %v200_v0 = vpop.permute.xlu0 %199 }
 0x30f   :  { %v208_v2 = vrot.slane %v200_v0, %v685_v6  ;;  %v215_v3 = vmul.f32 %v200_v0, %v689_v15  ;;  %v308_v15 = vpop.f32.mrf.mxu0 }
 0x310   :  { %v218_v4 = vadd.f32 %v217_v63, %v216_v62 }
 0x311   :  { %v223_v5 = vsel %vm115_vm0, %v215_v3, 0.0  ;;  %v209_v7 = vsel %vm134_vm1, %v208_v2, %v204_v1  ;;  %v453_v19 = vpop.f32.mrf.mxu0 }
 0x312   :  { %v219_v8 = vrot.slane %v218_v4, 2  ;;  %v224_v9 = vrot.slane %v223_v5, 4  ;;  %211 = vst.msk [vmem:[#allocation11] sm:$0x3] %vm137_vm2, %v209_v7 }
 0x314   :  { %v220_v10 = vadd.f32 %v219_v8, %v218_v4  ;;  %v225_v11 = vadd.f32 %v224_v9, %v223_v5 }
 0x316   :  { %v226_v12 = vrot.slane %v225_v11, 2  ;;  %v221_v13 = vrot.slane %v220_v10, 1 }
 0x318   :  { %v227_v14 = vadd.f32 %v226_v12, %v225_v11  ;;  %v222_v18 = vadd.f32 %v221_v13, %v220_v10 }
 0x31a   :  { %v228_v16 = vrot.slane %v227_v14, 1 }
 0x31c   :  { %v229_v17 = vadd.f32 %v228_v16, %v227_v14 }
 0x31e   :  { %v314_v6 = vsel %vm134_vm1, %v229_v17, %v222_v18 }
 0x31f   :  { %463 = vmatmul.mubr.msk.f32.vlgmr.msra.gmra.mxu1 %vm115_vm0, %v314_v6 }
 0x320   :  { %578 = shalt.err (!%p575_p10)
}
 0x321   :  { %417 = dma.vmem_to_hbm [thread:$0]  %s415_s3, 32, %s729_s6, [#allocation12]   ;;  %v432_v21 = vld [vmem:[%s727_s4] ss:$0 sm:$0xff]  ;;  %vm396_vm4 = vcmask 254976  }
 0x322   :  { %s628_s22 = smov [#allocation10]  }
 0x323   :  { %s404_s23 = sshll.u32 %s628_s22, 4  ;;  %s405_s23 = int_to_ptr.vmem [resolvable:$true] %s404_s23 }
 0x324   :  { %s587_s24 = scalar_lea.vmem %s405_s23, 32  ;;  %p592_p12 = scmp.lt.s32.totalorder %s405_s23, %s405_s23 }
 0x325   :  { %p588_p11 = scmp.ne.s32.totalorder %s405_s23, %s587_s24  ;;  %p593_p13 = scmp.lt.s32.totalorder %s587_s24, %s587_s24 }
 0x327   :  { %p594_p0 = por %p593_p13, %p592_p12 }
 0x329   :  { %p595_p1 = pnand %p594_p0, %p588_p11 }
 0x3df   :  { %v383_v20 = vpop.f32.mrf.mxu1 }
 0x3e0   :  { %v384_v22 = vadd.f32 %v383_v20, %v308_v15 }
 0x3e1   :  { %v464_v23 = vpop.f32.mrf.mxu1 }
 0x3e2   :  { %v394_v24 = vadd.f32 %v432_v21, %v384_v22 }
 0x3e4   :  { %485 = vtanh.f32 %v394_v24 }
 0x3f1   :  { %v486_v25 = vpop.eup %485 }
 0x3f2   :  { %397 = vst.msk [vmem:[#allocation10] sm:$0x3] %vm396_vm4, %v486_v25 }
 0x3f3   :  { %598 = shalt.err (!%p595_p1)
}
 0x3f4   :  { %407 = dma.vmem_to_hbm [thread:$0]  %s405_s23, 32, %s728_s5, [#allocation4]  }
 0x3f5   :  { %613 = dma.done.wait [#allocation4], 32  }
 0x3f6   :  { %614 = vsyncadd [#allocation4], 4294967264 }
 0x3f7   :  { %615 = dma.done.wait [#allocation12], 32  }
 0x3f8   :  { %616 = vsyncadd [#allocation12], 4294967264 }
 0x3f9   :  { %424 = vsyncpa [#allocation3], 1 }
 0x3fa   :  { %425 = vsyncpa [#allocation6], 1 }
 0x3fb   :  { %426 = vsyncpa [#allocation9], 1 }
 0x3fc   :  { %427 = vsyncpa [#allocation4], 1 }
 0x3fd   :  { %428 = vsyncpa [#allocation12], 1 }

</bundles_post_ra>
